<compile_context>
chip_gen: v7x
topology: tpu7x:2x2x1
jax: 0.10.0
libtpu: 0.0.40
codegen_flags: <defaults>
</compile_context>

<pallas_src>
import functools

import jax
import jax.numpy as jnp
from jax.experimental import pallas as pl
from jax.experimental.pallas import tpu as pltpu

EPS = 1e-5


def _basic_block_kernel(x_ref, pm1_ref, pp1_ref, wb1_ref, wb2_ref,
                        gmat_ref, gmatt_ref, g1_ref, b1_ref, g2_ref, b2_ref,
                        o_ref, *, inv_n):
    f32 = jnp.float32
    bf16 = jnp.bfloat16

    x = x_ref[...]                    # (R, L) f32, lane-dense (R=B*H, L=W*C)
    xb = x.astype(bf16)
    pm1 = pm1_ref[...]                # (R, R) bf16 0/1: read row above (h-1), 0 at edges
    pp1 = pp1_ref[...]                # (R, R) bf16 0/1: read row below (h+1), 0 at edges

    def conv3x3(inp_bf, wband_ref):
        # Row-shifted copies (zero-filled across image / batch boundaries).
        up = jnp.dot(pm1, inp_bf, preferred_element_type=f32).astype(bf16)
        dn = jnp.dot(pp1, inp_bf, preferred_element_type=f32).astype(bf16)
        # Fused im2col-style matmul: K = 3*W*C; the W-shift, zero padding and
        # cin->cout mixing are all folded into the banded weight.
        cols = jnp.concatenate([up, inp_bf, dn], axis=1)          # (R, 3L) bf16
        return jnp.dot(cols, wband_ref[...], preferred_element_type=f32)  # (R, L) f32

    def batchnorm(acc, gamma_ref, beta_ref):
        # One-pass stats: per-lane sums, then group lanes by channel (j % C)
        # with tiny 0/1 matmuls; var = E[x^2] - E[x]^2 (biased, training mode).
        s_lane = jnp.sum(acc, axis=0, keepdims=True)               # (1, L)
        q_lane = jnp.sum(acc * acc, axis=0, keepdims=True)         # (1, L)
        s_c = jnp.dot(s_lane, gmat_ref[...], preferred_element_type=f32)   # (1, C)
        q_c = jnp.dot(q_lane, gmat_ref[...], preferred_element_type=f32)   # (1, C)
        mean = s_c * inv_n
        var = q_c * inv_n - mean * mean
        scale = jax.lax.rsqrt(var + EPS) * gamma_ref[...]          # (1, C)
        shift = beta_ref[...] - mean * scale                       # (1, C)
        # Expand per-channel scale/shift back to per-lane vectors.
        scale_l = jnp.dot(scale, gmatt_ref[...], preferred_element_type=f32)  # (1, L)
        shift_l = jnp.dot(shift, gmatt_ref[...], preferred_element_type=f32)  # (1, L)
        return acc * scale_l + shift_l

    acc1 = conv3x3(xb, wb1_ref)
    h1 = jnp.maximum(batchnorm(acc1, g1_ref, b1_ref), 0.0)
    acc2 = conv3x3(h1.astype(bf16), wb2_ref)
    h2 = batchnorm(acc2, g2_ref, b2_ref)
    o_ref[...] = jnp.maximum(h2 + x, 0.0)                          # dense, unmasked store


def basic_block_pallas(x_nchw, w1_oihw, w2_oihw, gamma1, beta1, gamma2, beta2):
    """x_nchw: (B, C, H, W) f32. conv weights: (Cout=C, Cin=C, 3, 3). stride=1."""
    B, C, H, W = x_nchw.shape
    R, L = B * H, W * C
    f32, bf16 = jnp.float32, jnp.bfloat16

    # Lane-dense activation slab: row = (b, h), lane = (w, c).
    x2d = jnp.transpose(x_nchw, (0, 2, 3, 1)).reshape(R, L).astype(f32)

    # 0/1 row-shift matrices (shift along h; zero across image / batch edges).
    r = jnp.arange(R)
    h = r % H
    d = r[None, :] - r[:, None]                                    # r' - r
    pm1 = ((d == -1) & (h >= 1)[:, None]).astype(bf16)             # takes row h-1
    pp1 = ((d == 1) & (h < H - 1)[:, None]).astype(bf16)           # takes row h+1

    # Banded conv weight: rows = (ky, w, cin), cols = (w', cout), kx = w - w' + 1.
    def prep_wband(w_oihw):
        wk = jnp.transpose(w_oihw.astype(f32), (2, 3, 1, 0))       # (ky, kx, cin, cout)
        wi = jnp.arange(W)
        diff = wi[:, None] - wi[None, :]                           # w - w'
        kx = jnp.clip(diff + 1, 0, 2)
        band = wk[:, kx]                                           # (ky, w, w', cin, cout)
        band = band * (jnp.abs(diff) <= 1).astype(f32)[None, :, :, None, None]
        band = jnp.transpose(band, (0, 1, 3, 2, 4))                # (ky, w, cin, w', cout)
        return band.reshape(3 * L, L).astype(bf16)

    wband1 = prep_wband(w1_oihw)
    wband2 = prep_wband(w2_oihw)

    # Channel gather / scatter matrices for per-channel BN stats in packed layout.
    lane_c = jnp.arange(L) % C
    gmat = (lane_c[:, None] == jnp.arange(C)[None, :]).astype(f32)  # (L, C)
    gmat_t = gmat.T                                                  # (C, L)

    g1 = gamma1.reshape(1, C).astype(f32)
    b1 = beta1.reshape(1, C).astype(f32)
    g2 = gamma2.reshape(1, C).astype(f32)
    b2 = beta2.reshape(1, C).astype(f32)

    kern = functools.partial(_basic_block_kernel, inv_n=1.0 / (B * H * W))
    vmem = pl.BlockSpec(memory_space=pltpu.MemorySpace.VMEM)

    out2d = pl.pallas_call(
        kern,
        out_shape=jax.ShapeDtypeStruct((R, L), f32),
        in_specs=[vmem] * 11,
        out_specs=vmem,
        compiler_params=pltpu.CompilerParams(vmem_limit_bytes=32 * 1024 * 1024),
    )(x2d, pm1, pp1, wband1, wband2, gmat, gmat_t, g1, b1, g2, b2)

    return jnp.transpose(out2d.reshape(B, H, W, C), (0, 3, 1, 2))   # back to NCHW


# ---------------------------- pure-JAX reference ----------------------------
def _conv3x3_ref(x_nchw, w_oihw):
    return jax.lax.conv_general_dilated(
        x_nchw, w_oihw, window_strides=(1, 1), padding=((1, 1), (1, 1)),
        dimension_numbers=("NCHW", "OIHW", "NCHW"))


def _bn_ref(x_nchw, gamma, beta):
    mean = jnp.mean(x_nchw, axis=(0, 2, 3), keepdims=True)
    var = jnp.mean((x_nchw - mean) ** 2, axis=(0, 2, 3), keepdims=True)
    g = gamma.reshape(1, -1, 1, 1)
    b = beta.reshape(1, -1, 1, 1)
    return (x_nchw - mean) * jax.lax.rsqrt(var + EPS) * g + b


def basic_block_ref(x, w1, w2, g1, b1, g2, b2):
    out = jnp.maximum(_bn_ref(_conv3x3_ref(x, w1), g1, b1), 0.0)
    out = _bn_ref(_conv3x3_ref(out, w2), g2, b2)
    return jnp.maximum(out + x, 0.0)


if __name__ == "__main__":
    B, C, H, W = 2, 8, 16, 16  # inplanes = planes = 8, stride = 1; W*C = 128 lanes
    key = jax.random.PRNGKey(0)
    kx, kw1, kw2, kg1, kb1, kg2, kb2 = jax.random.split(key, 7)

    x = jax.random.normal(kx, (B, C, H, W), jnp.float32)
    w1 = jax.random.normal(kw1, (C, C, 3, 3), jnp.float32) * 0.1
    w2 = jax.random.normal(kw2, (C, C, 3, 3), jnp.float32) * 0.1
    gamma1 = 1.0 + 0.1 * jax.random.normal(kg1, (C,), jnp.float32)
    beta1 = 0.1 * jax.random.normal(kb1, (C,), jnp.float32)
    gamma2 = 1.0 + 0.1 * jax.random.normal(kg2, (C,), jnp.float32)
    beta2 = 0.1 * jax.random.normal(kb2, (C,), jnp.float32)

    out = basic_block_pallas(x, w1, w2, gamma1, beta1, gamma2, beta2)
    out = jax.block_until_ready(out)

    ref = basic_block_ref(x, w1, w2, gamma1, beta1, gamma2, beta2)
    assert out.shape == (B, C, H, W)
    # Tolerance reflects bf16 MXU operands (f32 accumulation) flowing through
    # two conv+BN stages; observed error is ~1e-2 worst case vs the f32 reference.
    assert jnp.allclose(out, ref, atol=5e-2, rtol=5e-2), \
        f"max abs err = {jnp.max(jnp.abs(out - ref))}"
    print("KERNEL_OK")
</pallas_src>

<mosaic_0001>
module attributes {stable_mosaic.version = 11 : i64} {
  func.func @_basic_block_kernel(%arg0: memref<32x128xf32, #tpu.memory_space<vmem>>, %arg1: memref<32x32xbf16, #tpu.memory_space<vmem>>, %arg2: memref<32x32xbf16, #tpu.memory_space<vmem>>, %arg3: memref<384x128xbf16, #tpu.memory_space<vmem>>, %arg4: memref<384x128xbf16, #tpu.memory_space<vmem>>, %arg5: memref<128x8xf32, #tpu.memory_space<vmem>>, %arg6: memref<8x128xf32, #tpu.memory_space<vmem>>, %arg7: memref<1x8xf32, #tpu.memory_space<vmem>>, %arg8: memref<1x8xf32, #tpu.memory_space<vmem>>, %arg9: memref<1x8xf32, #tpu.memory_space<vmem>>, %arg10: memref<1x8xf32, #tpu.memory_space<vmem>>, %arg11: memref<32x128xf32, #tpu.memory_space<vmem>>) attributes {dimension_semantics = [], scalar_prefetch = 0 : i64, scratch_operands = 0 : i64, tpu.core_type = #tpu.core_type<tc>} {
    %c0 = arith.constant 0 : index
    %c0_0 = arith.constant 0 : index
    %0 = vector.load %arg0[%c0, %c0_0] : memref<32x128xf32, #tpu.memory_space<vmem>>, vector<32x128xf32>
    %1 = arith.truncf %0 : vector<32x128xf32> to vector<32x128xbf16>
    %c0_1 = arith.constant 0 : index
    %c0_2 = arith.constant 0 : index
    %2 = vector.load %arg1[%c0_1, %c0_2] : memref<32x32xbf16, #tpu.memory_space<vmem>>, vector<32x32xbf16>
    %c0_3 = arith.constant 0 : index
    %c0_4 = arith.constant 0 : index
    %3 = vector.load %arg2[%c0_3, %c0_4] : memref<32x32xbf16, #tpu.memory_space<vmem>>, vector<32x32xbf16>
    %cst = arith.constant dense<0.000000e+00> : vector<32x128xf32>
    %4 = tpu.matmul %2, %1, %cst {dimension_numbers = #tpu.dot_dimension_numbers<[1], [0], [0], [1], [0, 0, 1, 1], [], []>} : vector<32x32xbf16>, vector<32x128xbf16>, vector<32x128xf32> -> vector<32x128xf32>
    %5 = arith.truncf %4 : vector<32x128xf32> to vector<32x128xbf16>
    %cst_5 = arith.constant dense<0.000000e+00> : vector<32x128xf32>
    %6 = tpu.matmul %3, %1, %cst_5 {dimension_numbers = #tpu.dot_dimension_numbers<[1], [0], [0], [1], [0, 0, 1, 1], [], []>} : vector<32x32xbf16>, vector<32x128xbf16>, vector<32x128xf32> -> vector<32x128xf32>
    %7 = arith.truncf %6 : vector<32x128xf32> to vector<32x128xbf16>
    %8 = tpu.concatenate %5, %1, %7 in 1 : vector<32x128xbf16>, vector<32x128xbf16>, vector<32x128xbf16> -> vector<32x384xbf16>
    %c0_6 = arith.constant 0 : index
    %c0_7 = arith.constant 0 : index
    %9 = vector.load %arg3[%c0_6, %c0_7] : memref<384x128xbf16, #tpu.memory_space<vmem>>, vector<384x128xbf16>
    %cst_8 = arith.constant dense<0.000000e+00> : vector<32x128xf32>
    %10 = tpu.matmul %8, %9, %cst_8 {dimension_numbers = #tpu.dot_dimension_numbers<[1], [0], [0], [1], [0, 0, 1, 1], [], []>} : vector<32x384xbf16>, vector<384x128xbf16>, vector<32x128xf32> -> vector<32x128xf32>
    %cst_9 = arith.constant dense<0.000000e+00> : vector<128xf32>
    %11 = vector.multi_reduction <add>, %10, %cst_9 [0] : vector<32x128xf32> to vector<128xf32>
    %12 = vector.shape_cast %11 : vector<128xf32> to vector<1x128xf32>
    %13 = arith.mulf %10, %10 : vector<32x128xf32>
    %cst_10 = arith.constant dense<0.000000e+00> : vector<128xf32>
    %14 = vector.multi_reduction <add>, %13, %cst_10 [0] : vector<32x128xf32> to vector<128xf32>
    %15 = vector.shape_cast %14 : vector<128xf32> to vector<1x128xf32>
    %c0_11 = arith.constant 0 : index
    %c0_12 = arith.constant 0 : index
    %16 = vector.load %arg5[%c0_11, %c0_12] : memref<128x8xf32, #tpu.memory_space<vmem>>, vector<128x8xf32>
    %cst_13 = arith.constant dense<0.000000e+00> : vector<1x8xf32>
    %17 = tpu.matmul %12, %16, %cst_13 {dimension_numbers = #tpu.dot_dimension_numbers<[1], [0], [0], [1], [0, 0, 1, 1], [], []>} : vector<1x128xf32>, vector<128x8xf32>, vector<1x8xf32> -> vector<1x8xf32>
    %c0_14 = arith.constant 0 : index
    %c0_15 = arith.constant 0 : index
    %18 = vector.load %arg5[%c0_14, %c0_15] : memref<128x8xf32, #tpu.memory_space<vmem>>, vector<128x8xf32>
    %cst_16 = arith.constant dense<0.000000e+00> : vector<1x8xf32>
    %19 = tpu.matmul %15, %18, %cst_16 {dimension_numbers = #tpu.dot_dimension_numbers<[1], [0], [0], [1], [0, 0, 1, 1], [], []>} : vector<1x128xf32>, vector<128x8xf32>, vector<1x8xf32> -> vector<1x8xf32>
    %cst_17 = arith.constant 0.001953125 : f32
    %20 = vector.broadcast %cst_17 : f32 to vector<1x8xf32>
    %21 = arith.mulf %17, %20 : vector<1x8xf32>
    %cst_18 = arith.constant 0.001953125 : f32
    %22 = vector.broadcast %cst_18 : f32 to vector<1x8xf32>
    %23 = arith.mulf %19, %22 : vector<1x8xf32>
    %24 = arith.mulf %21, %21 : vector<1x8xf32>
    %25 = arith.subf %23, %24 : vector<1x8xf32>
    %cst_19 = arith.constant 9.99999974E-6 : f32
    %26 = vector.broadcast %cst_19 : f32 to vector<1x8xf32>
    %27 = arith.addf %25, %26 : vector<1x8xf32>
    %28 = math.rsqrt %27 : vector<1x8xf32>
    %c0_20 = arith.constant 0 : index
    %c0_21 = arith.constant 0 : index
    %29 = vector.load %arg7[%c0_20, %c0_21] : memref<1x8xf32, #tpu.memory_space<vmem>>, vector<1x8xf32>
    %30 = arith.mulf %28, %29 : vector<1x8xf32>
    %c0_22 = arith.constant 0 : index
    %c0_23 = arith.constant 0 : index
    %31 = vector.load %arg8[%c0_22, %c0_23] : memref<1x8xf32, #tpu.memory_space<vmem>>, vector<1x8xf32>
    %32 = arith.mulf %21, %30 : vector<1x8xf32>
    %33 = arith.subf %31, %32 : vector<1x8xf32>
    %c0_24 = arith.constant 0 : index
    %c0_25 = arith.constant 0 : index
    %34 = vector.load %arg6[%c0_24, %c0_25] : memref<8x128xf32, #tpu.memory_space<vmem>>, vector<8x128xf32>
    %cst_26 = arith.constant dense<0.000000e+00> : vector<1x128xf32>
    %35 = tpu.matmul %30, %34, %cst_26 {dimension_numbers = #tpu.dot_dimension_numbers<[1], [0], [0], [1], [0, 0, 1, 1], [], []>} : vector<1x8xf32>, vector<8x128xf32>, vector<1x128xf32> -> vector<1x128xf32>
    %c0_27 = arith.constant 0 : index
    %c0_28 = arith.constant 0 : index
    %36 = vector.load %arg6[%c0_27, %c0_28] : memref<8x128xf32, #tpu.memory_space<vmem>>, vector<8x128xf32>
    %cst_29 = arith.constant dense<0.000000e+00> : vector<1x128xf32>
    %37 = tpu.matmul %33, %36, %cst_29 {dimension_numbers = #tpu.dot_dimension_numbers<[1], [0], [0], [1], [0, 0, 1, 1], [], []>} : vector<1x8xf32>, vector<8x128xf32>, vector<1x128xf32> -> vector<1x128xf32>
    %38 = vector.broadcast %35 : vector<1x128xf32> to vector<32x128xf32>
    %39 = arith.mulf %10, %38 : vector<32x128xf32>
    %40 = vector.broadcast %37 : vector<1x128xf32> to vector<32x128xf32>
    %41 = arith.addf %39, %40 : vector<32x128xf32>
    %cst_30 = arith.constant 0.000000e+00 : f32
    %42 = vector.broadcast %cst_30 : f32 to vector<32x128xf32>
    %43 = arith.maximumf %41, %42 : vector<32x128xf32>
    %44 = arith.truncf %43 : vector<32x128xf32> to vector<32x128xbf16>
    %cst_31 = arith.constant dense<0.000000e+00> : vector<32x128xf32>
    %45 = tpu.matmul %2, %44, %cst_31 {dimension_numbers = #tpu.dot_dimension_numbers<[1], [0], [0], [1], [0, 0, 1, 1], [], []>} : vector<32x32xbf16>, vector<32x128xbf16>, vector<32x128xf32> -> vector<32x128xf32>
    %46 = arith.truncf %45 : vector<32x128xf32> to vector<32x128xbf16>
    %cst_32 = arith.constant dense<0.000000e+00> : vector<32x128xf32>
    %47 = tpu.matmul %3, %44, %cst_32 {dimension_numbers = #tpu.dot_dimension_numbers<[1], [0], [0], [1], [0, 0, 1, 1], [], []>} : vector<32x32xbf16>, vector<32x128xbf16>, vector<32x128xf32> -> vector<32x128xf32>
    %48 = arith.truncf %47 : vector<32x128xf32> to vector<32x128xbf16>
    %49 = tpu.concatenate %46, %44, %48 in 1 : vector<32x128xbf16>, vector<32x128xbf16>, vector<32x128xbf16> -> vector<32x384xbf16>
    %c0_33 = arith.constant 0 : index
    %c0_34 = arith.constant 0 : index
    %50 = vector.load %arg4[%c0_33, %c0_34] : memref<384x128xbf16, #tpu.memory_space<vmem>>, vector<384x128xbf16>
    %cst_35 = arith.constant dense<0.000000e+00> : vector<32x128xf32>
    %51 = tpu.matmul %49, %50, %cst_35 {dimension_numbers = #tpu.dot_dimension_numbers<[1], [0], [0], [1], [0, 0, 1, 1], [], []>} : vector<32x384xbf16>, vector<384x128xbf16>, vector<32x128xf32> -> vector<32x128xf32>
    %cst_36 = arith.constant dense<0.000000e+00> : vector<128xf32>
    %52 = vector.multi_reduction <add>, %51, %cst_36 [0] : vector<32x128xf32> to vector<128xf32>
    %53 = vector.shape_cast %52 : vector<128xf32> to vector<1x128xf32>
    %54 = arith.mulf %51, %51 : vector<32x128xf32>
    %cst_37 = arith.constant dense<0.000000e+00> : vector<128xf32>
    %55 = vector.multi_reduction <add>, %54, %cst_37 [0] : vector<32x128xf32> to vector<128xf32>
    %56 = vector.shape_cast %55 : vector<128xf32> to vector<1x128xf32>
    %c0_38 = arith.constant 0 : index
    %c0_39 = arith.constant 0 : index
    %57 = vector.load %arg5[%c0_38, %c0_39] : memref<128x8xf32, #tpu.memory_space<vmem>>, vector<128x8xf32>
    %cst_40 = arith.constant dense<0.000000e+00> : vector<1x8xf32>
    %58 = tpu.matmul %53, %57, %cst_40 {dimension_numbers = #tpu.dot_dimension_numbers<[1], [0], [0], [1], [0, 0, 1, 1], [], []>} : vector<1x128xf32>, vector<128x8xf32>, vector<1x8xf32> -> vector<1x8xf32>
    %c0_41 = arith.constant 0 : index
    %c0_42 = arith.constant 0 : index
    %59 = vector.load %arg5[%c0_41, %c0_42] : memref<128x8xf32, #tpu.memory_space<vmem>>, vector<128x8xf32>
    %cst_43 = arith.constant dense<0.000000e+00> : vector<1x8xf32>
    %60 = tpu.matmul %56, %59, %cst_43 {dimension_numbers = #tpu.dot_dimension_numbers<[1], [0], [0], [1], [0, 0, 1, 1], [], []>} : vector<1x128xf32>, vector<128x8xf32>, vector<1x8xf32> -> vector<1x8xf32>
    %cst_44 = arith.constant 0.001953125 : f32
    %61 = vector.broadcast %cst_44 : f32 to vector<1x8xf32>
    %62 = arith.mulf %58, %61 : vector<1x8xf32>
    %cst_45 = arith.constant 0.001953125 : f32
    %63 = vector.broadcast %cst_45 : f32 to vector<1x8xf32>
    %64 = arith.mulf %60, %63 : vector<1x8xf32>
    %65 = arith.mulf %62, %62 : vector<1x8xf32>
    %66 = arith.subf %64, %65 : vector<1x8xf32>
    %cst_46 = arith.constant 9.99999974E-6 : f32
    %67 = vector.broadcast %cst_46 : f32 to vector<1x8xf32>
    %68 = arith.addf %66, %67 : vector<1x8xf32>
    %69 = math.rsqrt %68 : vector<1x8xf32>
    %c0_47 = arith.constant 0 : index
    %c0_48 = arith.constant 0 : index
    %70 = vector.load %arg9[%c0_47, %c0_48] : memref<1x8xf32, #tpu.memory_space<vmem>>, vector<1x8xf32>
    %71 = arith.mulf %69, %70 : vector<1x8xf32>
    %c0_49 = arith.constant 0 : index
    %c0_50 = arith.constant 0 : index
    %72 = vector.load %arg10[%c0_49, %c0_50] : memref<1x8xf32, #tpu.memory_space<vmem>>, vector<1x8xf32>
    %73 = arith.mulf %62, %71 : vector<1x8xf32>
    %74 = arith.subf %72, %73 : vector<1x8xf32>
    %c0_51 = arith.constant 0 : index
    %c0_52 = arith.constant 0 : index
    %75 = vector.load %arg6[%c0_51, %c0_52] : memref<8x128xf32, #tpu.memory_space<vmem>>, vector<8x128xf32>
    %cst_53 = arith.constant dense<0.000000e+00> : vector<1x128xf32>
    %76 = tpu.matmul %71, %75, %cst_53 {dimension_numbers = #tpu.dot_dimension_numbers<[1], [0], [0], [1], [0, 0, 1, 1], [], []>} : vector<1x8xf32>, vector<8x128xf32>, vector<1x128xf32> -> vector<1x128xf32>
    %c0_54 = arith.constant 0 : index
    %c0_55 = arith.constant 0 : index
    %77 = vector.load %arg6[%c0_54, %c0_55] : memref<8x128xf32, #tpu.memory_space<vmem>>, vector<8x128xf32>
    %cst_56 = arith.constant dense<0.000000e+00> : vector<1x128xf32>
    %78 = tpu.matmul %74, %77, %cst_56 {dimension_numbers = #tpu.dot_dimension_numbers<[1], [0], [0], [1], [0, 0, 1, 1], [], []>} : vector<1x8xf32>, vector<8x128xf32>, vector<1x128xf32> -> vector<1x128xf32>
    %79 = vector.broadcast %76 : vector<1x128xf32> to vector<32x128xf32>
    %80 = arith.mulf %51, %79 : vector<32x128xf32>
    %81 = vector.broadcast %78 : vector<1x128xf32> to vector<32x128xf32>
    %82 = arith.addf %80, %81 : vector<32x128xf32>
    %83 = arith.addf %82, %0 : vector<32x128xf32>
    %cst_57 = arith.constant 0.000000e+00 : f32
    %84 = vector.broadcast %cst_57 : f32 to vector<32x128xf32>
    %85 = arith.maximumf %83, %84 : vector<32x128xf32>
    %c0_58 = arith.constant 0 : index
    %c0_59 = arith.constant 0 : index
    %86 = vector.load %arg11[%c0_58, %c0_59] : memref<32x128xf32, #tpu.memory_space<vmem>>, vector<32x128xf32>
    tpu.vector_store %arg11[%c0_58, %c0_59], %85 {strides = array<i32>} : memref<32x128xf32, #tpu.memory_space<vmem>>, vector<32x128xf32>,
    return
  }
}

</mosaic_0001>

<bundles_post_ra>
// kernel: tpu_custom_call.1
= control target key start
LH: loop header
LB: loop body
LE: loop exit
PB: predicated region body
PF: predicated region fallthrough
CT: control target
= control target key end

     0   :  { %16 = vsyncpa [#allocation3], 0  ;;  %s2696_s0 = inlined_call_operand.vmem [shape: f32[32,128], index: 0, kind: input, shape index: {}]   ;;  %s2697_s1 = inlined_call_operand.vmem [shape: bf16[32,32], index: 1, kind: input, shape index: {}]   ;;  %s2698_s2 = inlined_call_operand.vmem [shape: bf16[32,32], index: 2, kind: input, shape index: {}]   ;;  %s2699_s3 = inlined_call_operand.hbm [shape: bf16[384,128], index: 3, kind: input, shape index: {}]   ;;  %s2700_s4 = inlined_call_operand.hbm [shape: bf16[384,128], index: 4, kind: input, shape index: {}]   ;;  %s2701_s5 = inlined_call_operand.vmem [shape: f32[128,8], index: 5, kind: input, shape index: {}]   ;;  %s2702_s6 = inlined_call_operand.vmem [shape: f32[8,128], index: 6, kind: input, shape index: {}]   ;;  %s2703_s7 = inlined_call_operand.vmem [shape: f32[1,8], index: 7, kind: input, shape index: {}]   ;;  %s2704_s8 = inlined_call_operand.vmem [shape: f32[1,8], index: 8, kind: input, shape index: {}]   ;;  %s2705_s9 = inlined_call_operand.vmem [shape: f32[1,8], index: 9, kind: input, shape index: {}]   ;;  %s2706_s10 = inlined_call_operand.vmem [shape: f32[1,8], index: 10, kind: input, shape index: {}]   ;;  %s2707_s11 = inlined_call_operand.hbm [shape: f32[32,128], index: 11, kind: output, shape index: {}]  }
   0x1   :  { %17 = vsyncpa [#allocation6], 0 }
   0x2   :  { %18 = vsyncpa [#allocation4], 0  ;;  %s2325_s17 = smov [#allocation2]   ;;  %s2253_s21 = scalar_lea.hbm %s2699_s3, 3072 }
   0x3   :  { %s30_s18 = sshll.u32 %s2325_s17, 4  ;;  %p2254_p0 = scmp.ne.s32.totalorder %s2699_s3, %s2253_s21  ;;  %s31_s18 = int_to_ptr.vmem [resolvable:$true] %s30_s18 }
   0x4   :  { %p2257_p1 = scmp.lt.u32.totalorder %s2253_s21, %s2699_s3 }
   0x6   :  { %p2259_p2 = pnand %p2257_p1, %p2254_p0 }
   0x8   :  { %2262 = shalt.err (!%p2259_p2)
}
   0x9   :  { %s2263_s26 = scalar_lea.vmem %s31_s18, 3072  ;;  %p2268_p4 = scmp.lt.s32.totalorder %s31_s18, %s31_s18 }
   0xa   :  { %p2264_p3 = scmp.ne.s32.totalorder %s31_s18, %s2263_s26  ;;  %p2269_p5 = scmp.lt.s32.totalorder %s2263_s26, %s2263_s26 }
   0xc   :  { %p2270_p6 = por %p2269_p5, %p2268_p4 }
   0xe   :  { %p2271_p7 = pnand %p2270_p6, %p2264_p3 }
  0x10   :  { %2274 = shalt.err (!%p2271_p7)
}
  0x11   :  { %s2326_s27 = smov 64   ;;  %s2327_s28 = smov 4  }
  0x12   :  { %36 = dma.hbm_to_vmem [thread:$0]  %s2699_s3, 3072, %s31_s18, [#allocation3], %s2326_s27, %s2326_s27, %s2327_s28  }
  0x13   :  { %s2328_s12 = smov [#allocation5]   ;;  %s2275_s16 = scalar_lea.hbm %s2700_s4, 3072 }
  0x14   :  { %s42_s13 = sshll.u32 %s2328_s12, 4  ;;  %p2276_p8 = scmp.ne.s32.totalorder %s2700_s4, %s2275_s16  ;;  %s43_s13 = int_to_ptr.vmem [resolvable:$true] %s42_s13 }
  0x15   :  { %p2279_p9 = scmp.lt.u32.totalorder %s2275_s16, %s2700_s4 }
  0x17   :  { %p2281_p10 = pnand %p2279_p9, %p2276_p8 }
  0x19   :  { %2284 = shalt.err (!%p2281_p10)
}
  0x1a   :  { %s2285_s22 = scalar_lea.vmem %s43_s13, 3072  ;;  %p2290_p12 = scmp.lt.s32.totalorder %s43_s13, %s43_s13 }
  0x1b   :  { %p2286_p11 = scmp.ne.s32.totalorder %s43_s13, %s2285_s22  ;;  %p2291_p13 = scmp.lt.s32.totalorder %s2285_s22, %s2285_s22 }
  0x1d   :  { %p2292_p0 = por %p2291_p13, %p2290_p12 }
  0x1f   :  { %p2293_p1 = pnand %p2292_p0, %p2286_p11 }
  0x21   :  { %2296 = shalt.err (!%p2293_p1)
}
  0x22   :  { %48 = dma.hbm_to_vmem [thread:$0]  %s2700_s4, 3072, %s43_s13, [#allocation6], %s2326_s27, %s2326_s27, %s2327_s28  }
  0x23   :  { %2319 = dma.done.wait [#allocation3], 3072  }
  0x24   :  { %2320 = vsyncadd [#allocation3], 4294964224 }
  0x25   :  { %2321 = dma.done.wait [#allocation6], 3072  }
  0x26   :  { %2322 = vsyncadd [#allocation6], 4294964224  ;;  %v68_v0 = vld [vmem:[%s2696_s0] sm:$0xff]  ;;  %v69_v1 = vld [vmem:[%s2696_s0 + $0x8] sm:$0xff]  ;;  %vm92_vm0 = vcmask 261120   ;;  %v2329_v34 = vmov 0.0|0.0  }
  0x27   :  { %v70_v2 = vld [vmem:[%s2696_s0 + $0x10] sm:$0xff]  ;;  %v72_v3 = vpack.c.bf16 %v69_v1, %v68_v0  ;;  %v71_v4 = vld [vmem:[%s2696_s0 + $0x18] sm:$0xff]  ;;  %v2436_v6 = vld [vmem:[%s2697_s1] sm:$0xff]   ;;  %vm2330_vm1 = vmmov 0   ;;  %vm697_vm2 = vcmask 64512  }
  0x28   :  { %v2431_v5 = vpack.c.bf16 %v71_v4, %v70_v2  ;;  %v2441_v7 = vld [vmem:[%s2698_s2] sm:$0xff]   ;;  %v2448_v8 = vld [vmem:[%s2697_s1 + $0x8] sm:$0xff]   ;;  %1859 = vmatprep.mubr.msk.bf16.mxu0 %vm92_vm0, %v2436_v6  ;;  %v2203_v16 = vld [vmem:[#allocation2 + $0x50] sm:$0xff]  }
  0x29   :  { %1855 = vmatprep.subr.bf16.mxu0 %v72_v3  ;;  %1863 = vmatprep.subr.bf16.mxu1 %v72_v3  ;;  %v2453_v9 = vld [vmem:[%s2698_s2 + $0x8] sm:$0xff]   ;;  %v2197_v10 = vld [vmem:[#allocation2 + $0x40] sm:$0xff]   ;;  %v2205_v17 = vld [vmem:[#allocation2 + $0x90] sm:$0xff]  }
  0x2a   :  { %1856 = vmatpush3.bf16.msra.mxu0 %v72_v3  ;;  %1864 = vmatpush3.bf16.msra.mxu1 %v72_v3  ;;  %v2198_v11 = vld [vmem:[#allocation2] sm:$0xff]   ;;  %v2200_v13 = vld [vmem:[#allocation2 + $0x48] sm:$0xff]   ;;  %v2204_v18 = vld [vmem:[#allocation2 + $0x10] sm:$0xff]  }
  0x2b   :  { %1857 = vmatprep.subr.bf16.mxu0 %v2431_v5  ;;  %1865 = vmatprep.subr.bf16.mxu1 %v2431_v5  ;;  %v2199_v12 = vld [vmem:[#allocation2 + $0x80] sm:$0xff]   ;;  %v2202_v14 = vld [vmem:[#allocation2 + $0x88] sm:$0xff]   ;;  %v2206_v19 = vld [vmem:[#allocation2 + $0x58] sm:$0xff]  }
  0x2c   :  { %1867 = vmatprep.mubr.msk.bf16.mxu1 %vm92_vm0, %v2441_v7  ;;  %v2201_v15 = vld [vmem:[#allocation2 + $0x8] sm:$0xff]   ;;  %v2208_v20 = vld [vmem:[#allocation2 + $0x98] sm:$0xff]   ;;  %v2209_v22 = vld [vmem:[#allocation2 + $0x60] sm:$0xff]  }
  0x2d   :  { %v2207_v21 = vld [vmem:[#allocation2 + $0x18] sm:$0xff]   ;;  %v2211_v23 = vld [vmem:[#allocation2 + $0xa0] sm:$0xff]   ;;  %v2212_v25 = vld [vmem:[#allocation2 + $0x68] sm:$0xff]  }
  0x2e   :  { %1858 = vmatpush3.bf16.msra.mxu0 %v2431_v5  ;;  %1866 = vmatpush3.bf16.msra.mxu1 %v2431_v5  ;;  %v2210_v24 = vld [vmem:[#allocation2 + $0x20] sm:$0xff]   ;;  %v2214_v26 = vld [vmem:[#allocation2 + $0xa8] sm:$0xff]   ;;  %v2215_v28 = vld [vmem:[#allocation2 + $0x70] sm:$0xff]  }
  0x2f   :  { %1695 = vmatprep.subr.bf16.mxu0 %v2197_v10  ;;  %1871 = vmatprep.subr.bf16.mxu1 %v2199_v12  ;;  %v2213_v27 = vld [vmem:[#allocation2 + $0x28] sm:$0xff]   ;;  %v2217_v29 = vld [vmem:[#allocation2 + $0xb0] sm:$0xff]   ;;  %v2218_v31 = vld [vmem:[#allocation2 + $0x78] sm:$0xff]  }
  0x30   :  { %v2216_v30 = vld [vmem:[#allocation2 + $0x30] sm:$0xff]   ;;  %v2219_v32 = vld [vmem:[#allocation2 + $0x38] sm:$0xff]   ;;  %v529_v39 = vld [vmem:[%s2701_s5] sm:$0xff] }
  0x31   :  { %1860 = vmatmul.mubr.msk.bf16.vlgmr.msra.gmra.mrb[0].mxu0 %vm92_vm0, %v2448_v8  ;;  %1868 = vmatmul.mubr.msk.bf16.vlgmr.msra.gmra.mrb[0].mxu1 %vm92_vm0, %v2453_v9  ;;  %v2220_v33 = vld [vmem:[#allocation2 + $0xb8] sm:$0xff]   ;;  %v530_v40 = vld [vmem:[%s2701_s5 + $0x8] sm:$0xff]  ;;  %v531_v50 = vld [vmem:[%s2701_s5 + $0x10] sm:$0xff] }
  0x32   :  { %1696 = vmatpush3.bf16.msra.mxu0 %v2198_v11  ;;  %1872 = vmatpush3.bf16.msra.mxu1 %v2199_v12  ;;  %v2473_v49 = vpack.c.bf16 %v530_v40, %v529_v39  ;;  %v532_v51 = vld [vmem:[%s2701_s5 + $0x18] sm:$0xff]  ;;  %v533_v53 = vld [vmem:[%s2701_s5 + $0x20] sm:$0xff]  ;;  %v534_v54 = vld [vmem:[%s2701_s5 + $0x28] sm:$0xff]  ;;  %v2331_v11 = vmov 0.0  }
  0x33   :  { %1697 = vmatprep.subr.bf16.mxu0 %v2200_v13  ;;  %1873 = vmatprep.subr.bf16.mxu1 %v2202_v14  ;;  %v2486_v52 = vpack.c.bf16 %v532_v51, %v531_v50  ;;  %v2498_v55 = vpack.c.bf16 %v534_v54, %v533_v53  ;;  %v535_v56 = vld [vmem:[%s2701_s5 + $0x30] sm:$0xff]  ;;  %v536_v57 = vld [vmem:[%s2701_s5 + $0x38] sm:$0xff]  ;;  %v537_v59 = vld [vmem:[%s2701_s5 + $0x40] sm:$0xff] }
  0x34   :  { %441 = vmatprep.mubr.bf16.mxu0 %v72_v3  ;;  %v2510_v58 = vpack.c.bf16 %v536_v57, %v535_v56  ;;  %v538_v60 = vld [vmem:[%s2701_s5 + $0x48] sm:$0xff]  ;;  %v539_v62 = vld [vmem:[%s2701_s5 + $0x50] sm:$0xff]  ;;  %v540_v63 = vld [vmem:[%s2701_s5 + $0x58] sm:$0xff] }
  0x35   :  { %v2522_v61 = vpack.c.bf16 %v538_v60, %v537_v59  ;;  %v2534_v0 = vpack.c.bf16 %v540_v63, %v539_v62  ;;  %v541_v1 = vld [vmem:[%s2701_s5 + $0x60] sm:$0xff]  ;;  %v542_v2 = vld [vmem:[%s2701_s5 + $0x68] sm:$0xff]  ;;  %v543_v4 = vld [vmem:[%s2701_s5 + $0x70] sm:$0xff] }
  0x36   :  { %1698 = vmatpush3.bf16.msra.mxu0 %v2201_v15  ;;  %1874 = vmatpush3.bf16.msra.mxu1 %v2202_v14  ;;  %v2546_v3 = vpack.c.bf16 %v542_v2, %v541_v1  ;;  %v2585_v59 = vld [vmem:[%s2702_s6] sm:$0xff] }
  0x37   :  { %1699 = vmatprep.subr.bf16.mxu0 %v2203_v16  ;;  %1875 = vmatprep.subr.bf16.mxu1 %v2205_v17 }
  0x3a   :  { %1700 = vmatpush3.bf16.msra.mxu0 %v2204_v18  ;;  %1876 = vmatpush3.bf16.msra.mxu1 %v2205_v17 }
  0x3b   :  { %1701 = vmatprep.subr.bf16.mxu0 %v2206_v19  ;;  %1877 = vmatprep.subr.bf16.mxu1 %v2208_v20 }
  0x3e   :  { %1702 = vmatpush3.bf16.msra.mxu0 %v2207_v21  ;;  %1878 = vmatpush3.bf16.msra.mxu1 %v2208_v20 }
  0x3f   :  { %1703 = vmatprep.subr.bf16.mxu0 %v2209_v22  ;;  %1879 = vmatprep.subr.bf16.mxu1 %v2211_v23 }
  0x42   :  { %1704 = vmatpush3.bf16.msra.mxu0 %v2210_v24  ;;  %1880 = vmatpush3.bf16.msra.mxu1 %v2211_v23 }
  0x43   :  { %1705 = vmatprep.subr.bf16.mxu0 %v2212_v25  ;;  %1881 = vmatprep.subr.bf16.mxu1 %v2214_v26 }
  0x46   :  { %1706 = vmatpush3.bf16.msra.mxu0 %v2213_v27  ;;  %1882 = vmatpush3.bf16.msra.mxu1 %v2214_v26 }
  0x47   :  { %1707 = vmatprep.subr.bf16.mxu0 %v2215_v28  ;;  %1883 = vmatprep.subr.bf16.mxu1 %v2217_v29 }
  0x4a   :  { %1708 = vmatpush3.bf16.msra.mxu0 %v2216_v30  ;;  %1884 = vmatpush3.bf16.msra.mxu1 %v2217_v29 }
  0x4b   :  { %1709 = vmatprep.subr.bf16.mxu0 %v2218_v31  ;;  %1885 = vmatprep.subr.bf16.mxu1 %v2220_v33 }
  0x4e   :  { %1710 = vmatpush3.bf16.msra.mxu0 %v2219_v32  ;;  %1886 = vmatpush3.bf16.msra.mxu1 %v2220_v33 }
  0x4f   :  { %2087 = vmatprep.subr.bf16.mxu0 %v2329_v34  ;;  %2111 = vmatprep.subr.bf16.mxu1 %v2329_v34 }
 0x104   :  { %v1861_v35 = vpop.f32.mrb[0].mxu0  ;;  %v1869_v36 = vpop.f32.mrb[0].mxu1 }
 0x105   :  { %v133_v37 = vpop.f32.mrb[1].mxu0  ;;  %v200_v38 = vpop.f32.mrb[1].mxu1 }
 0x106   :  { %v1862_v41 = vpop.f32.mrb[2].mxu0  ;;  %v1870_v42 = vpop.f32.mrb[2].mxu1 }
 0x107   :  { %v149_v43 = vpack.c.bf16 %v1862_v41, %v1861_v35  ;;  %v216_v44 = vpack.c.bf16 %v1870_v42, %v1869_v36  ;;  %v136_v45 = vpop.f32.mrb[3].mxu0  ;;  %v203_v46 = vpop.f32.mrb[3].mxu1 }
 0x108   :  { %v148_v47 = vpack.c.bf16 %v136_v45, %v133_v37  ;;  %v215_v48 = vpack.c.bf16 %v203_v46, %v200_v38 }
 0x10a   :  { %442 = vmatmul.mubr.bf16.vlgmr.msra.gmra.mrb[4].mxu0 %v148_v47  ;;  %1887 = vmatprep.mubr.bf16.mxu1 %v215_v48 }
 0x10b   :  { %1888 = vmatmul.mubr.bf16.vlgmr.msra.gmra.mrb[4].mxu1 %v216_v44  ;;  %449 = vmatprep.mubr.bf16.mxu0 %v2431_v5  ;;  %v544_v5 = vld [vmem:[%s2701_s5 + $0x78] sm:$0xff] }
 0x10c   :  { %2089 = vmatpush3.bf16.msra.mxu0 %v2473_v49  ;;  %2113 = vmatpush3.bf16.msra.mxu1 %v2473_v49  ;;  %v2558_v10 = vpack.c.bf16 %v544_v5, %v543_v4 }
 0x10d   :  { %2090 = vmatprep.subr.bf16.mxu0 %v2329_v34  ;;  %2114 = vmatprep.subr.bf16.mxu1 %v2329_v34 }
 0x10e   :  { %1958 = vmatprep.mubr.msk.f32.mxu1 %vm2330_vm1, %v2331_v11 }
 0x110   :  { %2092 = vmatpush3.bf16.msra.mxu0 %v2486_v52  ;;  %2116 = vmatpush3.bf16.msra.mxu1 %v2486_v52 }
 0x111   :  { %2093 = vmatprep.subr.bf16.mxu0 %v2329_v34  ;;  %2117 = vmatprep.subr.bf16.mxu1 %v2329_v34 }
 0x112   :  { %450 = vmatmul.mubr.bf16.gmra.mrb[8].mxu0 %v149_v43 }
 0x113   :  { %1923 = vmatprep.mubr.msk.f32.mxu0 %vm2330_vm1, %v2331_v11 }
 0x114   :  { %2095 = vmatpush3.bf16.msra.mxu0 %v2498_v55  ;;  %2119 = vmatpush3.bf16.msra.mxu1 %v2498_v55 }
 0x115   :  { %2096 = vmatprep.subr.bf16.mxu0 %v2329_v34  ;;  %2120 = vmatprep.subr.bf16.mxu1 %v2329_v34 }
 0x118   :  { %2098 = vmatpush3.bf16.msra.mxu0 %v2510_v58  ;;  %2122 = vmatpush3.bf16.msra.mxu1 %v2510_v58 }
 0x119   :  { %2099 = vmatprep.subr.bf16.mxu0 %v2329_v34  ;;  %2123 = vmatprep.subr.bf16.mxu1 %v2329_v34 }
 0x11c   :  { %2101 = vmatpush3.bf16.msra.mxu0 %v2522_v61  ;;  %2125 = vmatpush3.bf16.msra.mxu1 %v2522_v61 }
 0x11d   :  { %2102 = vmatprep.subr.bf16.mxu0 %v2329_v34  ;;  %2126 = vmatprep.subr.bf16.mxu1 %v2329_v34 }
 0x120   :  { %2104 = vmatpush3.bf16.msra.mxu0 %v2534_v0  ;;  %2128 = vmatpush3.bf16.msra.mxu1 %v2534_v0 }
 0x121   :  { %2105 = vmatprep.subr.bf16.mxu0 %v2329_v34  ;;  %2129 = vmatprep.subr.bf16.mxu1 %v2329_v34 }
 0x124   :  { %2107 = vmatpush3.bf16.msra.mxu0 %v2546_v3  ;;  %2131 = vmatpush3.bf16.msra.mxu1 %v2546_v3 }
 0x125   :  { %2108 = vmatprep.subr.bf16.mxu0 %v2329_v34  ;;  %2132 = vmatprep.subr.bf16.mxu1 %v2329_v34 }
 0x128   :  { %2110 = vmatpush3.bf16.msra.mxu0 %v2558_v10  ;;  %2134 = vmatpush3.bf16.msra.mxu1 %v2558_v10 }
 0x129   :  { %1961 = vmatprep.subr.mxu0 %v2331_v11  ;;  %1966 = vmatprep.subr.mxu1 %v2331_v11 }
 0x1dd   :  { %v1711_v12 = vpop.f32.mrb[4].mxu0 }
 0x1de   :  { %v1712_v13 = vpop.f32.mrb[5].mxu0  ;;  %v1889_v14 = vpop.f32.mrb[4].mxu1 }
 0x1df   :  { %v1713_v15 = vadd.f32 %v1712_v13, %v1711_v12  ;;  %v1714_v16 = vpop.f32.mrb[6].mxu0  ;;  %v492_v17 = vpop.f32.mrb[5].mxu1 }
 0x1e0   :  { %v1715_v18 = vpop.f32.mrb[7].mxu0  ;;  %v1890_v19 = vpop.f32.mrb[6].mxu1 }
 0x1e1   :  { %v2568_v20 = vadd.f32 %v1713_v15, %v492_v17  ;;  %v1716_v21 = vadd.f32 %v1715_v18, %v1714_v16  ;;  %v495_v22 = vpop.f32.mrb[7].mxu1  ;;  %v693_v17 = vld [vmem:[%s2704_s8] sm:$0x1] }
 0x1e3   :  { %v2570_v23 = vadd.f32 %v1716_v21, %v495_v22  ;;  %v516_v30 = vmul.f32 %v2568_v20, %v2568_v20  ;;  %v844_v21 = vlaneseq }
 0x1e5   :  { %v1717_v24 = vpop.f32.mrb[8].mxu0  ;;  %v517_v26 = vmul.f32 %v2570_v23, %v2570_v23  ;;  %v507_v31 = vadd.f32 %v2570_v23, %v2568_v20  ;;  %v845_v22 = vshrl.u32 %v844_v21, 7 }
 0x1e6   :  { %v1718_v25 = vpop.f32.mrb[9].mxu0 }
 0x1e7   :  { %v1719_v27 = vadd.f32 %v1718_v25, %v1717_v24  ;;  %v1720_v28 = vpop.f32.mrb[10].mxu0  ;;  %v520_v35 = vadd.f32 %v517_v26, %v516_v30  ;;  %v2601_v24 = vsub.s32 0, %v845_v22 }
 0x1e8   :  { %v1721_v29 = vpop.f32.mrb[11].mxu0 }
 0x1e9   :  { %v501_v32 = vadd.f32 %v1889_v14, %v1719_v27  ;;  %v1722_v33 = vadd.f32 %v1721_v29, %v1720_v28  ;;  %v691_v14 = vld [vmem:[%s2703_s7] sm:$0x1] }
 0x1eb   :  { %v508_v36 = vadd.f32 %v507_v31, %v501_v32  ;;  %v518_v37 = vmul.f32 %v501_v32, %v501_v32  ;;  %v504_v38 = vadd.f32 %v1890_v19, %v1722_v33 }
 0x1ed   :  { %v521_v39 = vadd.f32 %v520_v35, %v518_v37  ;;  %v509_v40 = vadd.f32 %v508_v36, %v504_v38  ;;  %v519_v41 = vmul.f32 %v504_v38, %v504_v38 }
 0x1ef   :  { %v510_v42 = vrot.slane %v509_v40, 4  ;;  %v522_v43 = vadd.f32 %v521_v39, %v519_v41 }
 0x1f1   :  { %v511_v44 = vadd.f32 %v510_v42, %v509_v40  ;;  %v523_v45 = vrot.slane %v522_v43, 4 }
 0x1f3   :  { %v512_v46 = vrot.slane %v511_v44, 2  ;;  %v524_v47 = vadd.f32 %v523_v45, %v522_v43 }
 0x1f5   :  { %v513_v48 = vadd.f32 %v512_v46, %v511_v44  ;;  %v525_v50 = vrot.slane %v524_v47, 2  ;;  %v2226_v46 = vld [vmem:[#allocation5 + $0x88] sm:$0xff]  }
 0x1f7   :  { %v514_v51 = vrot.slane %v513_v48, 1  ;;  %v526_v53 = vadd.f32 %v525_v50, %v524_v47  ;;  %v2225_v47 = vld [vmem:[#allocation5 + $0x8] sm:$0xff]   ;;  %v2229_v50 = vld [vmem:[#allocation5 + $0x90] sm:$0xff]  }
 0x1f9   :  { %v515_v54 = vadd.f32 %v514_v51, %v513_v48  ;;  %v527_v56 = vrot.slane %v526_v53, 1  ;;  %v2227_v48 = vld [vmem:[#allocation5 + $0x50] sm:$0xff]  }
 0x1fa   :  { %v2228_v51 = vld [vmem:[#allocation5 + $0x10] sm:$0xff]  }
 0x1fb   :  { %1924 = vmatmul.mubr.f32.vlgmr.msra.gmra.mrb[12].mxu0 %v515_v54  ;;  %v528_v57 = vadd.f32 %v527_v56, %v526_v53  ;;  %v2230_v53 = vld [vmem:[#allocation5 + $0x58] sm:$0xff]   ;;  %v2235_v56 = vld [vmem:[#allocation5 + $0xa0] sm:$0xff]  }
 0x1fc   :  { %1963 = vmatprep.mubr.msk.f32.mxu0 %vm2330_vm1, %v2331_v11  ;;  %1962 = vmatpush3.msra.mxu0 %v2585_v59  ;;  %v2232_v54 = vld [vmem:[#allocation5 + $0x98] sm:$0xff]  }
 0x1fd   :  { %1959 = vmatmul.mubr.f32.vlgmr.msra.gmra.mrb[8].mxu1 %v528_v57  ;;  %v2234_v57 = vld [vmem:[#allocation5 + $0x20] sm:$0xff]  }
 0x1fe   :  { %1968 = vmatprep.mubr.msk.f32.mxu1 %vm2330_vm1, %v2331_v11  ;;  %1967 = vmatpush3.msra.mxu1 %v2585_v59 }
 0x2ce   :  { %v611_v60 = vpop.f32.mrb[12].mxu0 }
 0x2cf   :  { %v685_v62 = vmul.f32 0.001953125, %v611_v60  ;;  %v1925_v63 = vpop.f32.mrb[13].mxu0  ;;  %v2236_v60 = vld [vmem:[#allocation5 + $0x68] sm:$0xff]  }
 0x2d0   :  { %v681_v1 = vpop.f32.mrb[8].mxu1  ;;  %v2237_v63 = vld [vmem:[#allocation5 + $0x28] sm:$0xff]  }
 0x2d1   :  { %v687_v2 = vmul.f32 %v685_v62, %v685_v62  ;;  %v686_v4 = vmul.f32 0.001953125, %v681_v1  ;;  %v1960_v5 = vpop.f32.mrb[9].mxu1  ;;  %v2239_v1 = vld [vmem:[#allocation5 + $0x70] sm:$0xff]  }
 0x2d2   :  { %v2242_v5 = vld [vmem:[#allocation5 + $0x78] sm:$0xff]  }
 0x2d3   :  { %v688_v12 = vsub.f32 %v686_v4, %v687_v2  ;;  %v2241_v2 = vld [vmem:[#allocation5 + $0xb0] sm:$0xff]  }
 0x2d4   :  { %v2240_v4 = vld [vmem:[#allocation5 + $0x30] sm:$0xff]  }
 0x2d5   :  { %v689_v13 = vadd.f32 1e-05, %v688_v12  ;;  %v2243_v12 = vld [vmem:[#allocation5 + $0x38] sm:$0xff]  }
 0x2d7   :  { %2245 = vrsqrt.f32 %v689_v13  ;;  %v2244_v13 = vld [vmem:[#allocation5 + $0xb8] sm:$0xff]  }
 0x2e1   :  { %v2246_v15 = vpop.eup %2245 }
 0x2e2   :  { %v692_v16 = vmul.f32 %v2246_v15, %v691_v14 }
 0x2e4   :  { %1964 = vmatmul.mubr.msk.f32.vlgmr.msra.gmra.mrb[14].mxu0 %vm697_vm2, %v692_v16  ;;  %v694_v18 = vmul.f32 %v692_v16, %v685_v62  ;;  %v2238_v62 = vld [vmem:[#allocation5 + $0xa8] sm:$0xff]  }
 0x2e5   :  { %1975 = vmatprep.mubr.msk.bf16.mxu0 %vm92_vm0, %v2436_v6 }
 0x2e6   :  { %v695_v19 = vsub.f32 %v693_v17, %v694_v18 }
 0x2e8   :  { %1969 = vmatmul.mubr.msk.f32.vlgmr.msra.gmra.mrb[10].mxu1 %vm697_vm2, %v695_v19 }
 0x2e9   :  { %1983 = vmatprep.mubr.msk.bf16.mxu1 %vm92_vm0, %v2441_v7 }
 0x3b7   :  { %v767_v25 = vpop.f32.mrb[14].mxu0 }
 0x3b8   :  { %v847_v26 = vrot.slane %v767_v25, %v2601_v24  ;;  %v1965_v27 = vpop.f32.mrb[15].mxu0 }
 0x3ba   :  { %v848_v28 = vmul.f32 %v847_v26, %v2568_v20  ;;  %v849_v30 = vmul.f32 %v847_v26, %v2570_v23  ;;  %v850_v6 = vmul.f32 %v847_v26, %v501_v32  ;;  %v851_v31 = vmul.f32 %v847_v26, %v504_v38  ;;  %v2221_v20 = vld [vmem:[#allocation5 + $0x40] sm:$0xff]   ;;  %v2224_v38 = vld [vmem:[#allocation5 + $0x48] sm:$0xff]  }
 0x3bb   :  { %v840_v29 = vpop.f32.mrb[10].mxu1  ;;  %v2223_v23 = vld [vmem:[#allocation5 + $0x80] sm:$0xff]  }
 0x3bc   :  { %v855_v33 = vrot.slane %v840_v29, %v2601_v24  ;;  %v1970_v35 = vpop.f32.mrb[11].mxu1  ;;  %v2222_v32 = vld [vmem:[#allocation5] sm:$0xff]  }
 0x3be   :  { %v856_v36 = vadd.f32 %v855_v33, %v848_v28  ;;  %v857_v7 = vadd.f32 %v855_v33, %v849_v30  ;;  %v858_v37 = vadd.f32 %v855_v33, %v850_v6  ;;  %v859_v39 = vadd.f32 %v855_v33, %v851_v31 }
 0x3c0   :  { %v860_v40 = vmax.f32 %v856_v36, 0.0  ;;  %v861_v41 = vmax.f32 %v857_v7, 0.0  ;;  %v862_v42 = vmax.f32 %v858_v37, 0.0  ;;  %v863_v43 = vmax.f32 %v859_v39, 0.0 }
 0x3c2   :  { %v864_v44 = vpack.c.bf16 %v861_v41, %v860_v40  ;;  %v2607_v45 = vpack.c.bf16 %v863_v43, %v862_v42 }
 0x3c4   :  { %1971 = vmatprep.subr.bf16.mxu0 %v864_v44  ;;  %1979 = vmatprep.subr.bf16.mxu1 %v864_v44 }
 0x3c5   :  { %1972 = vmatpush3.bf16.msra.mxu0 %v864_v44  ;;  %1980 = vmatpush3.bf16.msra.mxu1 %v864_v44 }
 0x3c6   :  { %1973 = vmatprep.subr.bf16.mxu0 %v2607_v45  ;;  %1981 = vmatprep.subr.bf16.mxu1 %v2607_v45 }
 0x3c9   :  { %1974 = vmatpush3.bf16.msra.mxu0 %v2607_v45  ;;  %1982 = vmatpush3.bf16.msra.mxu1 %v2607_v45 }
 0x3ca   :  { %1779 = vmatprep.subr.bf16.mxu0 %v2221_v20  ;;  %1987 = vmatprep.subr.bf16.mxu1 %v2223_v23 }
 0x3cc   :  { %1976 = vmatmul.mubr.msk.bf16.vlgmr.msra.gmra.mrb[16].mxu0 %vm92_vm0, %v2448_v8  ;;  %1984 = vmatmul.mubr.msk.bf16.vlgmr.msra.gmra.mrb[12].mxu1 %vm92_vm0, %v2453_v9  ;;  %v2231_v8 = vld [vmem:[#allocation5 + $0x18] sm:$0xff]   ;;  %v2233_v9 = vld [vmem:[#allocation5 + $0x60] sm:$0xff]  }
 0x3cd   :  { %1192 = vmatprep.mubr.bf16.mxu0 %v864_v44  ;;  %1780 = vmatpush3.bf16.msra.mxu0 %v2222_v32 }
 0x3ce   :  { %1988 = vmatpush3.bf16.msra.mxu1 %v2223_v23  ;;  %1781 = vmatprep.subr.bf16.mxu0 %v2224_v38 }
 0x3cf   :  { %1989 = vmatprep.subr.bf16.mxu1 %v2226_v46 }
 0x3d1   :  { %1782 = vmatpush3.bf16.msra.mxu0 %v2225_v47 }
 0x3d2   :  { %1990 = vmatpush3.bf16.msra.mxu1 %v2226_v46  ;;  %1783 = vmatprep.subr.bf16.mxu0 %v2227_v48 }
 0x3d3   :  { %1991 = vmatprep.subr.bf16.mxu1 %v2229_v50 }
 0x3d5   :  { %1784 = vmatpush3.bf16.msra.mxu0 %v2228_v51 }
 0x3d6   :  { %1992 = vmatpush3.bf16.msra.mxu1 %v2229_v50  ;;  %1785 = vmatprep.subr.bf16.mxu0 %v2230_v53 }
 0x3d7   :  { %1993 = vmatprep.subr.bf16.mxu1 %v2232_v54 }
 0x3d9   :  { %1786 = vmatpush3.bf16.msra.mxu0 %v2231_v8 }
 0x3da   :  { %1994 = vmatpush3.bf16.msra.mxu1 %v2232_v54  ;;  %1787 = vmatprep.subr.bf16.mxu0 %v2233_v9 }
 0x3db   :  { %1995 = vmatprep.subr.bf16.mxu1 %v2235_v56 }
 0x3dd   :  { %1788 = vmatpush3.bf16.msra.mxu0 %v2234_v57 }
 0x3de   :  { %1996 = vmatpush3.bf16.msra.mxu1 %v2235_v56  ;;  %1789 = vmatprep.subr.bf16.mxu0 %v2236_v60 }
 0x3df   :  { %1997 = vmatprep.subr.bf16.mxu1 %v2238_v62 }
 0x3e1   :  { %1790 = vmatpush3.bf16.msra.mxu0 %v2237_v63 }
 0x3e2   :  { %1998 = vmatpush3.bf16.msra.mxu1 %v2238_v62  ;;  %1791 = vmatprep.subr.bf16.mxu0 %v2239_v1 }
 0x3e3   :  { %1999 = vmatprep.subr.bf16.mxu1 %v2241_v2 }
 0x3e5   :  { %1792 = vmatpush3.bf16.msra.mxu0 %v2240_v4 }
 0x3e6   :  { %2000 = vmatpush3.bf16.msra.mxu1 %v2241_v2  ;;  %1793 = vmatprep.subr.bf16.mxu0 %v2242_v5 }
 0x3e7   :  { %2001 = vmatprep.subr.bf16.mxu1 %v2244_v13 }
 0x3e9   :  { %1794 = vmatpush3.bf16.msra.mxu0 %v2243_v12 }
 0x3ea   :  { %2002 = vmatpush3.bf16.msra.mxu1 %v2244_v13  ;;  %2135 = vmatprep.subr.bf16.mxu0 %v2329_v34 }
 0x3eb   :  { %2159 = vmatprep.subr.bf16.mxu1 %v2329_v34 }
 0x49f   :  { %v1977_v14 = vpop.f32.mrb[16].mxu0  ;;  %v1985_v15 = vpop.f32.mrb[12].mxu1 }
 0x4a0   :  { %v900_v16 = vpop.f32.mrb[17].mxu0  ;;  %v951_v17 = vpop.f32.mrb[13].mxu1 }
 0x4a1   :  { %v1978_v18 = vpop.f32.mrb[18].mxu0  ;;  %v1986_v19 = vpop.f32.mrb[14].mxu1 }
 0x4a2   :  { %v916_v21 = vpack.c.bf16 %v1978_v18, %v1977_v14  ;;  %v967_v22 = vpack.c.bf16 %v1986_v19, %v1985_v15  ;;  %v903_v25 = vpop.f32.mrb[19].mxu0  ;;  %v954_v26 = vpop.f32.mrb[15].mxu1 }
 0x4a3   :  { %v915_v27 = vpack.c.bf16 %v903_v25, %v900_v16  ;;  %v966_v28 = vpack.c.bf16 %v954_v26, %v951_v17  ;;  %v1426_v16 = vld [vmem:[%s2705_s9] sm:$0x1]  ;;  %s2332_s9 = smov [#allocation7]  }
 0x4a5   :  { %1193 = vmatmul.mubr.bf16.vlgmr.msra.gmra.mrb[20].mxu0 %v915_v27  ;;  %2003 = vmatprep.mubr.bf16.mxu1 %v966_v28 }
 0x4a6   :  { %1200 = vmatprep.mubr.bf16.mxu0 %v2607_v45  ;;  %2004 = vmatmul.mubr.bf16.vlgmr.msra.gmra.mrb[16].mxu1 %v967_v22 }
 0x4a7   :  { %2137 = vmatpush3.bf16.msra.mxu0 %v2473_v49  ;;  %2161 = vmatpush3.bf16.msra.mxu1 %v2473_v49 }
 0x4a8   :  { %2138 = vmatprep.subr.bf16.mxu0 %v2329_v34  ;;  %2162 = vmatprep.subr.bf16.mxu1 %v2329_v34 }
 0x4a9   :  { %2074 = vmatprep.mubr.msk.f32.mxu1 %vm2330_vm1, %v2331_v11 }
 0x4ab   :  { %2140 = vmatpush3.bf16.msra.mxu0 %v2486_v52  ;;  %2164 = vmatpush3.bf16.msra.mxu1 %v2486_v52 }
 0x4ac   :  { %2141 = vmatprep.subr.bf16.mxu0 %v2329_v34  ;;  %2165 = vmatprep.subr.bf16.mxu1 %v2329_v34 }
 0x4ad   :  { %1201 = vmatmul.mubr.bf16.gmra.mrb[24].mxu0 %v916_v21 }
 0x4ae   :  { %2039 = vmatprep.mubr.msk.f32.mxu0 %vm2330_vm1, %v2331_v11 }
 0x4af   :  { %2143 = vmatpush3.bf16.msra.mxu0 %v2498_v55  ;;  %2167 = vmatpush3.bf16.msra.mxu1 %v2498_v55 }
 0x4b0   :  { %2144 = vmatprep.subr.bf16.mxu0 %v2329_v34  ;;  %2168 = vmatprep.subr.bf16.mxu1 %v2329_v34 }
 0x4b3   :  { %2146 = vmatpush3.bf16.msra.mxu0 %v2510_v58  ;;  %2170 = vmatpush3.bf16.msra.mxu1 %v2510_v58 }
 0x4b4   :  { %2147 = vmatprep.subr.bf16.mxu0 %v2329_v34  ;;  %2171 = vmatprep.subr.bf16.mxu1 %v2329_v34 }
 0x4b7   :  { %2149 = vmatpush3.bf16.msra.mxu0 %v2522_v61  ;;  %2173 = vmatpush3.bf16.msra.mxu1 %v2522_v61 }
 0x4b8   :  { %2150 = vmatprep.subr.bf16.mxu0 %v2329_v34  ;;  %2174 = vmatprep.subr.bf16.mxu1 %v2329_v34 }
 0x4bb   :  { %2152 = vmatpush3.bf16.msra.mxu0 %v2534_v0  ;;  %2176 = vmatpush3.bf16.msra.mxu1 %v2534_v0 }
 0x4bc   :  { %2153 = vmatprep.subr.bf16.mxu0 %v2329_v34  ;;  %2177 = vmatprep.subr.bf16.mxu1 %v2329_v34 }
 0x4bf   :  { %2155 = vmatpush3.bf16.msra.mxu0 %v2546_v3  ;;  %2179 = vmatpush3.bf16.msra.mxu1 %v2546_v3 }
 0x4c0   :  { %2156 = vmatprep.subr.bf16.mxu0 %v2329_v34  ;;  %2180 = vmatprep.subr.bf16.mxu1 %v2329_v34 }
 0x4c3   :  { %2158 = vmatpush3.bf16.msra.mxu0 %v2558_v10  ;;  %2182 = vmatpush3.bf16.msra.mxu1 %v2558_v10 }
 0x4c4   :  { %2077 = vmatprep.subr.mxu0 %v2331_v11  ;;  %2082 = vmatprep.subr.mxu1 %v2331_v11 }
 0x578   :  { %v1795_v49 = vpop.f32.mrb[20].mxu0 }
 0x579   :  { %v1796_v52 = vpop.f32.mrb[21].mxu0  ;;  %v2005_v55 = vpop.f32.mrb[16].mxu1 }
 0x57a   :  { %v1797_v58 = vadd.f32 %v1796_v52, %v1795_v49  ;;  %v1798_v61 = vpop.f32.mrb[22].mxu0  ;;  %v1243_v0 = vpop.f32.mrb[17].mxu1 }
 0x57b   :  { %v1799_v29 = vpop.f32.mrb[23].mxu0  ;;  %v2006_v3 = vpop.f32.mrb[18].mxu1 }
 0x57c   :  { %v1244_v30 = vadd.f32 %v1797_v58, %v1243_v0  ;;  %v1800_v6 = vadd.f32 %v1799_v29, %v1798_v61  ;;  %v1246_v31 = vpop.f32.mrb[19].mxu1 }
 0x57e   :  { %v1247_v34 = vadd.f32 %v1800_v6, %v1246_v31  ;;  %v1267_v39 = vmul.f32 %v1244_v30, %v1244_v30  ;;  %v2249_v6 = vld [vmem:[%s2696_s0] sm:$0xff] }
 0x580   :  { %v1801_v33 = vpop.f32.mrb[24].mxu0  ;;  %v1268_v36 = vmul.f32 %v1247_v34, %v1247_v34  ;;  %v1258_v40 = vadd.f32 %v1247_v34, %v1244_v30 }
 0x581   :  { %v1802_v35 = vpop.f32.mrb[25].mxu0 }
 0x582   :  { %v1803_v10 = vadd.f32 %v1802_v35, %v1801_v33  ;;  %v1804_v7 = vpop.f32.mrb[26].mxu0  ;;  %v1271_v43 = vadd.f32 %v1268_v36, %v1267_v39  ;;  %v2252_v35 = vld [vmem:[%s2696_s0 + $0x18] sm:$0xff] }
 0x583   :  { %v1805_v37 = vpop.f32.mrb[27].mxu0 }
 0x584   :  { %v1252_v41 = vadd.f32 %v2005_v55, %v1803_v10  ;;  %v1806_v42 = vadd.f32 %v1805_v37, %v1804_v7 }
 0x586   :  { %v1259_v44 = vadd.f32 %v1258_v40, %v1252_v41  ;;  %v1269_v45 = vmul.f32 %v1252_v41, %v1252_v41  ;;  %v1255_v20 = vadd.f32 %v2006_v3, %v1806_v42 }
 0x588   :  { %v1272_v23 = vadd.f32 %v1271_v43, %v1269_v45  ;;  %v1260_v32 = vadd.f32 %v1259_v44, %v1255_v20  ;;  %v1270_v38 = vmul.f32 %v1255_v20, %v1255_v20 }
 0x58a   :  { %v1261_v46 = vrot.slane %v1260_v32, 4  ;;  %v1273_v47 = vadd.f32 %v1272_v23, %v1270_v38 }
 0x58c   :  { %v1262_v48 = vadd.f32 %v1261_v46, %v1260_v32  ;;  %v1274_v50 = vrot.slane %v1273_v47, 4 }
 0x58e   :  { %v1263_v51 = vrot.slane %v1262_v48, 2  ;;  %v1275_v53 = vadd.f32 %v1274_v50, %v1273_v47 }
 0x590   :  { %v1264_v54 = vadd.f32 %v1263_v51, %v1262_v48  ;;  %v1276_v8 = vrot.slane %v1275_v53, 2 }
 0x592   :  { %v1265_v9 = vrot.slane %v1264_v54, 1  ;;  %v1277_v56 = vadd.f32 %v1276_v8, %v1275_v53 }
 0x594   :  { %v1266_v57 = vadd.f32 %v1265_v9, %v1264_v54  ;;  %v1278_v60 = vrot.slane %v1277_v56, 1 }
 0x596   :  { %2040 = vmatmul.mubr.f32.vlgmr.msra.gmra.mrb[28].mxu0 %v1266_v57  ;;  %v1279_v62 = vadd.f32 %v1278_v60, %v1277_v56 }
 0x597   :  { %2078 = vmatpush3.msra.mxu0 %v2585_v59  ;;  %2079 = vmatprep.mubr.msk.f32.mxu0 %vm2330_vm1, %v2331_v11 }
 0x598   :  { %2075 = vmatmul.mubr.f32.vlgmr.msra.gmra.mrb[20].mxu1 %v1279_v62 }
 0x599   :  { %2083 = vmatpush3.msra.mxu1 %v2585_v59  ;;  %2084 = vmatprep.mubr.msk.f32.mxu1 %vm2330_vm1, %v2331_v11  ;;  %v1428_v11 = vld [vmem:[%s2706_s10] sm:$0x1]  ;;  %s1610_s10 = sshll.u32 %s2332_s9, 4  ;;  %s1611_s10 = int_to_ptr.vmem [resolvable:$true] %s1610_s10 }
 0x59a   :  { %s2297_s1 = scalar_lea.vmem %s1611_s10, 512  ;;  %p2302_p3 = scmp.lt.s32.totalorder %s1611_s10, %s1611_s10 }
 0x59b   :  { %p2298_p2 = scmp.ne.s32.totalorder %s1611_s10, %s2297_s1  ;;  %p2303_p4 = scmp.lt.s32.totalorder %s2297_s1, %s2297_s1 }
 0x59d   :  { %p2304_p5 = por %p2303_p4, %p2302_p3 }
 0x59f   :  { %p2305_p6 = pnand %p2304_p5, %p2298_p2 }
 0x669   :  { %v1346_v63 = vpop.f32.mrb[28].mxu0 }
 0x66a   :  { %v1420_v1 = vmul.f32 0.001953125, %v1346_v63  ;;  %v2041_v2 = vpop.f32.mrb[29].mxu0 }
 0x66b   :  { %v1416_v4 = vpop.f32.mrb[20].mxu1 }
 0x66c   :  { %v1422_v5 = vmul.f32 %v1420_v1, %v1420_v1  ;;  %v1421_v12 = vmul.f32 0.001953125, %v1416_v4  ;;  %v2076_v13 = vpop.f32.mrb[21].mxu1 }
 0x66e   :  { %v1423_v14 = vsub.f32 %v1421_v12, %v1422_v5 }
 0x670   :  { %v1424_v15 = vadd.f32 1e-05, %v1423_v14 }
 0x672   :  { %2247 = vrsqrt.f32 %v1424_v15 }
 0x67c   :  { %v2248_v17 = vpop.eup %2247 }
 0x67d   :  { %v1427_v18 = vmul.f32 %v2248_v17, %v1426_v16 }
 0x67f   :  { %2080 = vmatmul.mubr.msk.f32.vlgmr.msra.gmra.mrb[30].mxu0 %vm697_vm2, %v1427_v18  ;;  %v1429_v59 = vmul.f32 %v1427_v18, %v1420_v1 }
 0x681   :  { %v1430_v19 = vsub.f32 %v1428_v11, %v1429_v59 }
 0x683   :  { %2085 = vmatmul.mubr.msk.f32.vlgmr.msra.gmra.mrb[22].mxu1 %vm697_vm2, %v1430_v19 }
 0x752   :  { %v1500_v21 = vpop.f32.mrb[30].mxu0 }
 0x753   :  { %v1580_v22 = vrot.slane %v1500_v21, %v2601_v24  ;;  %v2081_v25 = vpop.f32.mrb[31].mxu0 }
 0x755   :  { %v1581_v26 = vmul.f32 %v1580_v22, %v1244_v30  ;;  %v1582_v28 = vmul.f32 %v1580_v22, %v1247_v34  ;;  %v1583_v49 = vmul.f32 %v1580_v22, %v1252_v41  ;;  %v1584_v52 = vmul.f32 %v1580_v22, %v1255_v20  ;;  %v2250_v30 = vld [vmem:[%s2696_s0 + $0x8] sm:$0xff] }
 0x756   :  { %v1573_v27 = vpop.f32.mrb[22].mxu1 }
 0x757   :  { %v1588_v55 = vrot.slane %v1573_v27, %v2601_v24  ;;  %v2086_v58 = vpop.f32.mrb[23].mxu1  ;;  %v2251_v24 = vld [vmem:[%s2696_s0 + $0x10] sm:$0xff] }
 0x759   :  { %v1589_v61 = vadd.f32 %v1588_v55, %v1581_v26  ;;  %v1590_v0 = vadd.f32 %v1588_v55, %v1582_v28  ;;  %v1591_v29 = vadd.f32 %v1588_v55, %v1583_v49  ;;  %v1592_v3 = vadd.f32 %v1588_v55, %v1584_v52 }
 0x75b   :  { %v1593_v31 = vadd.f32 %v2249_v6, %v1589_v61  ;;  %v1594_v34 = vadd.f32 %v2250_v30, %v1590_v0  ;;  %v1595_v33 = vadd.f32 %v2251_v24, %v1591_v29  ;;  %v1596_v36 = vadd.f32 %v2252_v35, %v1592_v3 }
 0x75d   :  { %v1597_v10 = vmax.f32 %v1593_v31, 0.0  ;;  %v1598_v7 = vmax.f32 %v1594_v34, 0.0  ;;  %v1599_v37 = vmax.f32 %v1595_v33, 0.0  ;;  %v1600_v39 = vmax.f32 %v1596_v36, 0.0 }
 0x75f   :  { %1601 = vst [vmem:[#allocation7] sm:$0xff] %v1597_v10  ;;  %1602 = vst [vmem:[#allocation7 + $0x8] sm:$0xff] %v1598_v7 }
 0x760   :  { %1603 = vst [vmem:[#allocation7 + $0x10] sm:$0xff] %v1599_v37  ;;  %1604 = vst [vmem:[#allocation7 + $0x18] sm:$0xff] %v1600_v39 }
 0x761   :  { %2308 = shalt.err (!%p2305_p6)
}
 0x762   :  { %s2309_s0 = scalar_lea.hbm %s2707_s11, 512 }
 0x763   :  { %p2310_p7 = scmp.ne.s32.totalorder %s2707_s11, %s2309_s0  ;;  %p2313_p8 = scmp.lt.u32.totalorder %s2309_s0, %s2707_s11 }
 0x765   :  { %p2315_p9 = pnand %p2313_p8, %p2310_p7 }
 0x767   :  { %2318 = shalt.err (!%p2315_p9)
}
 0x768   :  { %s2333_s23 = smov 128   ;;  %s2334_s24 = smov 8  }
 0x769   :  { %1616 = dma.vmem_to_hbm [thread:$0]  %s1611_s10, 512, %s2707_s11, [#allocation4], %s2333_s23, %s2333_s23, %s2334_s24  }
 0x76a   :  { %2323 = dma.done.wait [#allocation4], 512  }
 0x76b   :  { %2324 = vsyncadd [#allocation4], 4294966784 }
 0x76c   :  { %1620 = vsyncpa [#allocation3], 1 }
 0x76d   :  { %1621 = vsyncpa [#allocation6], 1 }
 0x76e   :  { %1622 = vsyncpa [#allocation4], 1 }

</bundles_post_ra>
